<compile_context>
chip_gen: v5e
topology: v5e:2x2
jax: 0.10.0
libtpu: 0.0.40
codegen_flags: <defaults>
</compile_context>

<pallas_src>
import jax
import jax.numpy as jnp
from jax.experimental import pallas as pl
from jax.experimental.pallas import tpu as pltpu


def attention_kernel(hidden_ref, enc_ref, w1_ref, w2_ref, bias_ref, v_ref,
                     out_ref, hid_proj_ref, scores_ref):
    # hidden_ref: (tb, 2H)        enc_ref: (ts, tb, 2H)
    # w1_ref/w2_ref: (2H, H)      bias_ref/v_ref: (1, H)
    # out_ref: (tb, S)            hid_proj_ref: (tb, H)   scores_ref: (S, tb)
    s = pl.program_id(1)                     # seq-tile index (reduction axis)
    ts, tb, _ = enc_ref.shape
    H = w1_ref.shape[1]

    # ---- once per batch tile: hidden @ W1 + b, cached across all seq steps ----
    @pl.when(s == 0)
    def _():
        hid_proj_ref[...] = (
            jnp.dot(hidden_ref[...], w1_ref[...],
                    preferred_element_type=jnp.float32)
            + bias_ref[...].astype(jnp.float32))

    # ---- encoder projection: one big MXU matmul on the flattened tile ----
    enc = enc_ref[...]                                        # (ts, tb, 2H) native dtype
    if tb % 8 == 0:
        # layout-clean collapse of (ts, tb) into the sublane (M) axis
        proj = jnp.dot(enc.reshape(ts * tb, enc.shape[-1]), w2_ref[...],
                       preferred_element_type=jnp.float32).reshape(ts, tb, H)
    else:
        # fallback for sublane-unfriendly batch tiles (small/odd batch)
        proj = jnp.einsum('sbe,eh->sbh', enc, w2_ref[...],
                          preferred_element_type=jnp.float32)

    energy = jnp.tanh(proj + hid_proj_ref[...][None, :, :])   # (ts, tb, H) f32

    # ---- H -> 1 projection as VPU multiply + lane reduction (v is (1, H)) ----
    v_row = v_ref[...].astype(jnp.float32)[None, :, :]        # (1, 1, H)
    scores = jnp.sum(energy * v_row, axis=-1)                 # (ts, tb) f32

    # stash raw scores for this seq tile (pass 1 of the two-pass softmax)
    row0 = pl.multiple_of(s * ts, ts)
    scores_ref[pl.ds(row0, ts), :] = scores

    # ---- last seq step: lane-dense softmax over the full seq axis (pass 2) ----
    @pl.when(s == pl.num_programs(1) - 1)
    def _():
        sc = scores_ref[...].T                                # (tb, S): seq on lanes
        m = jnp.max(sc, axis=-1, keepdims=True)
        e = jnp.exp(sc - m)
        out_ref[...] = (e / jnp.sum(e, axis=-1, keepdims=True)).astype(out_ref.dtype)


def _pick_tile(total, cap, align=8):
    """Largest divisor of `total` that is <= cap, preferring multiples of `align`."""
    cap = int(max(1, min(cap, total)))
    divisors = [d for d in range(1, cap + 1) if total % d == 0]
    aligned = [d for d in divisors if d % align == 0]
    return (aligned or divisors)[-1]


def attention_forward(hidden, encoder_outputs, w_attn, b_attn, w_v, *,
                      seq_tile=None, batch_tile=None):
    """hidden: (B, 2H); encoder_outputs: (S, B, 2H).
    w_attn: PyTorch-layout (H, 4H); b_attn: (H,); w_v: (1, H). Returns (S, B)."""
    S, B, E = encoder_outputs.shape          # E == 2H
    H = w_attn.shape[0]
    assert E == 2 * H and w_attn.shape == (H, 4 * H) and hidden.shape == (B, E)

    # y = x @ W.T + b ; split W.T into the "hidden" half and the "encoder" half
    w_t = w_attn.T                           # (4H, H)
    w1 = w_t[:E, :]                          # (2H, H)  multiplies repeated hidden
    w2 = w_t[E:, :]                          # (2H, H)  multiplies encoder outputs
    bias = b_attn.reshape(1, H)
    v = w_v.reshape(1, H)

    # Tile selection: batch tiles in sublane multiples of 8; seq tiles sized so a
    # double-buffered encoder tile stays well under the scoped-VMEM default on
    # v5e/v6e/v7x (~4 MiB per buffer).
    tb = batch_tile if batch_tile is not None else _pick_tile(B, 128, 8)
    bytes_per_seq_row = tb * E * encoder_outputs.dtype.itemsize
    ts_cap = max(8, (4 * 1024 * 1024) // max(1, bytes_per_seq_row))
    ts = seq_tile if seq_tile is not None else _pick_tile(S, ts_cap, 8)
    assert B % tb == 0 and S % ts == 0, "tile sizes must divide (B, S)"

    grid = (B // tb, S // ts)                # batch parallel, seq = reduction

    in_bytes = (encoder_outputs.size * encoder_outputs.dtype.itemsize
                + hidden.size * hidden.dtype.itemsize
                + (w1.size + w2.size + bias.size + v.size) * w_attn.dtype.itemsize)
    cost = pl.CostEstimate(
        flops=2 * S * B * E * H + 2 * B * E * H + 2 * S * B * H,
        transcendentals=S * B * (H + 1),
        bytes_accessed=in_bytes + S * B * 4)

    out_bs = pl.pallas_call(
        attention_kernel,
        out_shape=jax.ShapeDtypeStruct((B, S), jnp.float32),
        grid_spec=pltpu.PrefetchScalarGridSpec(
            num_scalar_prefetch=0,
            grid=grid,
            in_specs=[
                pl.BlockSpec((tb, E), lambda b, s: (b, 0)),          # hidden
                pl.BlockSpec((ts, tb, E), lambda b, s: (s, b, 0)),   # encoder_outputs
                pl.BlockSpec((E, H), lambda b, s: (0, 0)),           # W1 (resident)
                pl.BlockSpec((E, H), lambda b, s: (0, 0)),           # W2 (resident)
                pl.BlockSpec((1, H), lambda b, s: (0, 0)),           # bias
                pl.BlockSpec((1, H), lambda b, s: (0, 0)),           # v
            ],
            out_specs=pl.BlockSpec((tb, S), lambda b, s: (b, 0)),    # resident over s
            scratch_shapes=[
                pltpu.VMEM((tb, H), jnp.float32),   # cached hidden @ W1 + b
                pltpu.VMEM((S, tb), jnp.float32),   # raw scores for this batch tile
            ]),
        compiler_params=pltpu.CompilerParams(
            dimension_semantics=("parallel", "arbitrary")),
        cost_estimate=cost,
    )(hidden, encoder_outputs, w1, w2, bias, v)

    # PyTorch returns time-major (seq_len, batch); transposing the tiny (B, S)
    # probability matrix is wrapper-side layout plumbing, not compute.
    return out_bs.T


def attention_reference(hidden, encoder_outputs, w_attn, b_attn, w_v):
    S = encoder_outputs.shape[0]
    hid_rep = jnp.broadcast_to(hidden[None], (S,) + hidden.shape)
    x = jnp.concatenate([hid_rep, encoder_outputs], axis=2)
    energy = jnp.tanh(
        jnp.einsum('sbi,oi->sbo', x, w_attn,
                   precision=jax.lax.Precision.HIGHEST) + b_attn)
    attn = jnp.einsum('sbo,ko->sbk', energy, w_v,
                      precision=jax.lax.Precision.HIGHEST)[..., 0]
    return jax.nn.softmax(attn, axis=0)


if __name__ == "__main__":
    hidden_dim = 64          # H; feature width 2H = 128 (lane-aligned)
    batch = 16
    seq_len = 16
    two_h = 2 * hidden_dim

    key = jax.random.PRNGKey(0)
    k1, k2, k3, k4, k5 = jax.random.split(key, 5)

    # deterministic "parameters" (shapes from nn.Linear in __init__)
    w_attn = 0.1 * jax.random.normal(k1, (hidden_dim, 4 * hidden_dim), jnp.float32)
    b_attn = 0.1 * jax.random.normal(k2, (hidden_dim,), jnp.float32)
    w_v = 0.1 * jax.random.normal(k3, (1, hidden_dim), jnp.float32)

    # inputs
    hidden = jax.random.normal(k4, (batch, two_h), jnp.float32)
    encoder_outputs = jax.random.normal(k5, (seq_len, batch, two_h), jnp.float32)

    # seq_tile=8, batch_tile=8 -> grid (2, 2): exercises both the parallel batch
    # axis and the multi-step seq accumulation / two-pass softmax.
    out = attention_forward(hidden, encoder_outputs, w_attn, b_attn, w_v,
                            seq_tile=8, batch_tile=8)
    out = jax.block_until_ready(out)

    ref = attention_reference(hidden, encoder_outputs, w_attn, b_attn, w_v)

    assert out.shape == (seq_len, batch)
    # f32 matmuls may use different MXU pass counts in Mosaic vs XLA; tolerance
    # sized for that, still far tighter than any semantic error would produce.
    assert jnp.allclose(out, ref, atol=2e-3, rtol=2e-3), "mismatch vs reference"
    # columns should each sum to 1 (softmax over the seq axis)
    assert jnp.allclose(jnp.sum(out, axis=0), jnp.ones((batch,)), atol=1e-5)

    print("KERNEL_OK")
</pallas_src>

<mosaic_0001>
module attributes {stable_mosaic.version = 11 : i64} {
  func.func @attention_kernel(%arg0: i32, %arg1: i32, %arg2: memref<8x128xf32, #tpu.memory_space<vmem>>, %arg3: memref<8x8x128xf32, #tpu.memory_space<vmem>>, %arg4: memref<128x64xf32, #tpu.memory_space<vmem>>, %arg5: memref<128x64xf32, #tpu.memory_space<vmem>>, %arg6: memref<1x64xf32, #tpu.memory_space<vmem>>, %arg7: memref<1x64xf32, #tpu.memory_space<vmem>>, %arg8: memref<8x16xf32, #tpu.memory_space<vmem>>, %arg9: memref<8x64xf32, #tpu.memory_space<vmem>>, %arg10: memref<16x8xf32, #tpu.memory_space<vmem>>) attributes {dimension_semantics = [#tpu.dimension_semantics<parallel>, #tpu.dimension_semantics<arbitrary>], iteration_bounds = array<i64: 2, 2>, scalar_prefetch = 0 : i64, scratch_operands = 2 : i64, tpu.core_type = #tpu.core_type<tc>, window_params = [{transform_indices = @transform_0, window_bounds = array<i64: 8, 128>}, {transform_indices = @transform_1, window_bounds = array<i64: 8, 8, 128>}, {pipeline_mode = #tpu.pipeline_mode<synchronous>, transform_indices = @transform_2, window_bounds = array<i64: 128, 64>}, {pipeline_mode = #tpu.pipeline_mode<synchronous>, transform_indices = @transform_3, window_bounds = array<i64: 128, 64>}, {pipeline_mode = #tpu.pipeline_mode<synchronous>, transform_indices = @transform_4, window_bounds = array<i64: 1, 64>}, {pipeline_mode = #tpu.pipeline_mode<synchronous>, transform_indices = @transform_5, window_bounds = array<i64: 1, 64>}, {transform_indices = @transform_6, window_bounds = array<i64: 8, 16>}]} {
    %c0_i32 = arith.constant 0 : i32
    %0 = arith.cmpi eq, %arg1, %c0_i32 : i32
    %1 = arith.extui %0 : i1 to i32
    %c0_i32_0 = arith.constant 0 : i32
    %2 = arith.cmpi ne, %1, %c0_i32_0 : i32
    scf.if %2 {
      %c0_12 = arith.constant 0 : index
      %c0_13 = arith.constant 0 : index
      %25 = vector.load %arg2[%c0_12, %c0_13] : memref<8x128xf32, #tpu.memory_space<vmem>>, vector<8x128xf32>
      %c0_14 = arith.constant 0 : index
      %c0_15 = arith.constant 0 : index
      %26 = vector.load %arg4[%c0_14, %c0_15] : memref<128x64xf32, #tpu.memory_space<vmem>>, vector<128x64xf32>
      %cst_16 = arith.constant dense<0.000000e+00> : vector<8x64xf32>
      %27 = tpu.matmul %25, %26, %cst_16 {dimension_numbers = #tpu.dot_dimension_numbers<[1], [0], [0], [1], [0, 0, 1, 1], [], []>} : vector<8x128xf32>, vector<128x64xf32>, vector<8x64xf32> -> vector<8x64xf32>
      %c0_17 = arith.constant 0 : index
      %c0_18 = arith.constant 0 : index
      %28 = vector.load %arg6[%c0_17, %c0_18] : memref<1x64xf32, #tpu.memory_space<vmem>>, vector<1x64xf32>
      %29 = vector.broadcast %28 : vector<1x64xf32> to vector<8x64xf32>
      %30 = arith.addf %27, %29 : vector<8x64xf32>
      %c0_19 = arith.constant 0 : index
      %c0_20 = arith.constant 0 : index
      %31 = vector.load %arg9[%c0_19, %c0_20] : memref<8x64xf32, #tpu.memory_space<vmem>>, vector<8x64xf32>
      tpu.vector_store %arg9[%c0_19, %c0_20], %30 {strides = array<i32>} : memref<8x64xf32, #tpu.memory_space<vmem>>, vector<8x64xf32>,
    } else {
    }
    %c0 = arith.constant 0 : index
    %c0_1 = arith.constant 0 : index
    %c0_2 = arith.constant 0 : index
    %3 = vector.load %arg3[%c0, %c0_1, %c0_2] : memref<8x8x128xf32, #tpu.memory_space<vmem>>, vector<8x8x128xf32>
    %4 = vector.shape_cast %3 : vector<8x8x128xf32> to vector<64x128xf32>
    %c0_3 = arith.constant 0 : index
    %c0_4 = arith.constant 0 : index
    %5 = vector.load %arg5[%c0_3, %c0_4] : memref<128x64xf32, #tpu.memory_space<vmem>>, vector<128x64xf32>
    %cst = arith.constant dense<0.000000e+00> : vector<64x64xf32>
    %6 = tpu.matmul %4, %5, %cst {dimension_numbers = #tpu.dot_dimension_numbers<[1], [0], [0], [1], [0, 0, 1, 1], [], []>} : vector<64x128xf32>, vector<128x64xf32>, vector<64x64xf32> -> vector<64x64xf32>
    %7 = vector.shape_cast %6 : vector<64x64xf32> to vector<8x8x64xf32>
    %c0_5 = arith.constant 0 : index
    %c0_6 = arith.constant 0 : index
    %8 = vector.load %arg9[%c0_5, %c0_6] : memref<8x64xf32, #tpu.memory_space<vmem>>, vector<8x64xf32>
    %9 = vector.shape_cast %8 : vector<8x64xf32> to vector<1x8x64xf32>
    %10 = vector.broadcast %9 : vector<1x8x64xf32> to vector<8x8x64xf32>
    %11 = arith.addf %7, %10 : vector<8x8x64xf32>
    %12 = math.tanh %11 : vector<8x8x64xf32>
    %c0_7 = arith.constant 0 : index
    %c0_8 = arith.constant 0 : index
    %13 = vector.load %arg7[%c0_7, %c0_8] : memref<1x64xf32, #tpu.memory_space<vmem>>, vector<1x64xf32>
    %14 = vector.shape_cast %13 : vector<1x64xf32> to vector<1x1x64xf32>
    %15 = vector.broadcast %14 : vector<1x1x64xf32> to vector<8x8x64xf32>
    %16 = arith.mulf %12, %15 : vector<8x8x64xf32>
    %cst_9 = arith.constant dense<0.000000e+00> : vector<8x8xf32>
    %17 = vector.multi_reduction <add>, %16, %cst_9 [2] : vector<8x8x64xf32> to vector<8x8xf32>
    %c8_i32 = arith.constant 8 : i32
    %18 = arith.muli %arg1, %c8_i32 : i32
    %19 = tpu.assume_multiple %18, 8 : i32
    %20 = arith.index_cast %19 : i32 to index
    %c0_10 = arith.constant 0 : index
    %21 = vector.load %arg10[%20, %c0_10] : memref<16x8xf32, #tpu.memory_space<vmem>>, vector<8x8xf32>
    tpu.vector_store %arg10[%20, %c0_10], %17 {strides = array<i32>} : memref<16x8xf32, #tpu.memory_space<vmem>>, vector<8x8xf32>,
    %c1_i32 = arith.constant 1 : i32
    %22 = arith.cmpi eq, %arg1, %c1_i32 : i32
    %23 = arith.extui %22 : i1 to i32
    %c0_i32_11 = arith.constant 0 : i32
    %24 = arith.cmpi ne, %23, %c0_i32_11 : i32
    scf.if %24 {
      %c0_12 = arith.constant 0 : index
      %c0_13 = arith.constant 0 : index
      %25 = vector.load %arg10[%c0_12, %c0_13] : memref<16x8xf32, #tpu.memory_space<vmem>>, vector<16x8xf32>
      %26 = tpu.transpose %25, [1, 0] : vector<16x8xf32> -> vector<8x16xf32>
      %cst_14 = arith.constant dense<0xFF800000> : vector<8xf32>
      %27 = vector.multi_reduction <maximumf>, %26, %cst_14 [1] : vector<8x16xf32> to vector<8xf32>
      %28 = vector.shape_cast %27 : vector<8xf32> to vector<8x1xf32>
      %29 = vector.broadcast %28 : vector<8x1xf32> to vector<8x16xf32>
      %30 = arith.subf %26, %29 : vector<8x16xf32>
      %31 = math.exp %30 : vector<8x16xf32>
      %cst_15 = arith.constant dense<0.000000e+00> : vector<8xf32>
      %32 = vector.multi_reduction <add>, %31, %cst_15 [1] : vector<8x16xf32> to vector<8xf32>
      %33 = vector.shape_cast %32 : vector<8xf32> to vector<8x1xf32>
      %34 = vector.broadcast %33 : vector<8x1xf32> to vector<8x16xf32>
      %35 = arith.divf %31, %34 : vector<8x16xf32>
      %c0_16 = arith.constant 0 : index
      %c0_17 = arith.constant 0 : index
      %36 = vector.load %arg8[%c0_16, %c0_17] : memref<8x16xf32, #tpu.memory_space<vmem>>, vector<8x16xf32>
      tpu.vector_store %arg8[%c0_16, %c0_17], %35 {strides = array<i32>} : memref<8x16xf32, #tpu.memory_space<vmem>>, vector<8x16xf32>,
    } else {
    }
    return
  }
  func.func @transform_0(%arg0: i32, %arg1: i32) -> (i32, i32) {
    %c0_i32 = arith.constant 0 : i32
    %c0_i32_0 = arith.constant 0 : i32
    return %arg0, %c0_i32 : i32, i32
  }
  func.func @transform_1(%arg0: i32, %arg1: i32) -> (i32, i32, i32) {
    %c0_i32 = arith.constant 0 : i32
    %c0_i32_0 = arith.constant 0 : i32
    return %arg1, %arg0, %c0_i32 : i32, i32, i32
  }
  func.func @transform_2(%arg0: i32, %arg1: i32) -> (i32, i32) {
    %c0_i32 = arith.constant 0 : i32
    %c0_i32_0 = arith.constant 0 : i32
    %c0_i32_1 = arith.constant 0 : i32
    return %c0_i32, %c0_i32_0 : i32, i32
  }
  func.func @transform_3(%arg0: i32, %arg1: i32) -> (i32, i32) {
    %c0_i32 = arith.constant 0 : i32
    %c0_i32_0 = arith.constant 0 : i32
    %c0_i32_1 = arith.constant 0 : i32
    return %c0_i32, %c0_i32_0 : i32, i32
  }
  func.func @transform_4(%arg0: i32, %arg1: i32) -> (i32, i32) {
    %c0_i32 = arith.constant 0 : i32
    %c0_i32_0 = arith.constant 0 : i32
    %c0_i32_1 = arith.constant 0 : i32
    return %c0_i32, %c0_i32_0 : i32, i32
  }
  func.func @transform_5(%arg0: i32, %arg1: i32) -> (i32, i32) {
    %c0_i32 = arith.constant 0 : i32
    %c0_i32_0 = arith.constant 0 : i32
    %c0_i32_1 = arith.constant 0 : i32
    return %c0_i32, %c0_i32_0 : i32, i32
  }
  func.func @transform_6(%arg0: i32, %arg1: i32) -> (i32, i32) {
    %c0_i32 = arith.constant 0 : i32
    %c0_i32_0 = arith.constant 0 : i32
    return %arg0, %c0_i32 : i32, i32
  }
}

</mosaic_0001>

<bundles_post_ra>
// kernel: tpu_custom_call.1
= control target key start
LH: loop header
LB: loop body
LE: loop exit
PB: predicated region body
PF: predicated region fallthrough
CT: control target
= control target key end

     0   :  { %s1344_s0 = inlined_call_operand.vmem [shape: f32[16,128], index: 0, kind: input, shape index: {}]   ;;  %s1345_s1 = inlined_call_operand.vmem [shape: f32[16,16,128], index: 1, kind: input, shape index: {}]   ;;  %s1346_s2 = inlined_call_operand.vmem [shape: f32[128,64], index: 2, kind: input, shape index: {}]   ;;  %s1347_s3 = inlined_call_operand.vmem [shape: f32[128,64], index: 3, kind: input, shape index: {}]   ;;  %s1348_s4 = inlined_call_operand.vmem [shape: f32[1,64], index: 4, kind: input, shape index: {}]   ;;  %s1349_s5 = inlined_call_operand.vmem [shape: f32[1,64], index: 5, kind: input, shape index: {}]   ;;  %s1350_s6 = inlined_call_operand.hbm [shape: f32[16,16], index: 6, kind: output, shape index: {}]  }
   0x1   :  { %1356 = sst [smem:[#allocation12_spill]] %s1345_s1 }
   0x2   :  { %11 = vsyncpa [#allocation6], 0 }
   0x3   :  { %13 = vsyncpa [#allocation6 + $0x1], 0  ;;  %s1048_s21 = smov 0   ;;  %s1050_s22 = smov 0  }
   0x4   :  { %s1052_s23 = smov 0   ;;  %s1054_s24 = smov 0  }
   0x5   :  { %s1056_s25 = smov 0   ;;  %s1058_s26 = smov 0  }
   0x6   :  { %s1060_s27 = smov 0   ;;  %s1062_s28 = smov 0  }
   0x7   :  { %s1064_s29 = smov 0   ;;  %s1066_s30 = smov 0  }
   0x8 LB: > { %1357 = sst [smem:[#allocation8_spill]] %s1003_s28  ;;  %s723_s7 = sadd.s32 4294967295, %s1011_s30   ;;  %s1011_s30 = sphi %s1066_s30, %s19_s30   ;;  %s1007_s29 = sphi %s1064_s29, %s1369_s29   ;;  %s1003_s28 = sphi %s1062_s28, %s1368_s28   ;;  %s999_s27 = sphi %s1060_s27, %s1367_s27   ;;  %s995_s26 = sphi %s1058_s26, %s1366_s26   ;;  %s991_s25 = sphi %s1056_s25, %s1374_s25   ;;  %s987_s24 = sphi %s1054_s24, %s1373_s24   ;;  %s983_s23 = sphi %s1052_s23, %s1372_s23   ;;  %s979_s22 = sphi %s1050_s22, %s1371_s22   ;;  %s975_s21 = sphi %s1048_s21, %s1370_s21  }
   0x9   : > { %1358 = sst [smem:[#allocation9_spill]] %s1007_s29  ;;  %s724_s8 = sadd.s32 4294967294, %s1011_s30  }
   0xa   : > { %s28_s9 = sadd.s32 1, %s1003_s28  ;;  %s31_s10 = sadd.s32 1, %s1007_s29 }
   0xb   : > { %p29_p0 = scmp.ge.s32.totalorder %s28_s9, 2  ;;  %s66_s11 = sadd.s32 1, %s991_s25 }
   0xc   : > { %p73_p1 = scmp.ne.s32.totalorder %s991_s25, %s987_s24  ;;  %p74_p2 = scmp.eq.s32.totalorder %s1011_s30, 0 }
   0xd   : > { %s1376_s9 = smov (%p29_p0, %s28_s9), 0  ;;  %s1378_s10 = smov (!%p29_p0, %s31_s10), %s1007_s29 }
   0xe   : > { %1359 = sst [smem:[#allocation10_spill]] %s1376_s9  ;;  %s61_s12 = ssub.s32 %s1003_s28, %s1376_s9 }
   0xf   : > { %p1111_p3 = por %p74_p2, %p73_p1  ;;  %p33_p4 = scmp.ge.s32.totalorder %s1378_s10, 2 }
  0x10   : > { %s176_s14 = sadd.s32 1, %s983_s23  ;;  %p186_p5 = scmp.ne.s32.totalorder %s983_s23, %s979_s22 }
  0x11   : > { %p187_p6 = scmp.eq.s32.totalorder %s723_s7, 3  ;;  %s1380_s10 = smov (%p33_p4, %s1378_s10), 0 }
  0x12   : > { %1361 = sst [smem:[#allocation11_spill]] %s1380_s10  ;;  %p192_p8 = scmp.ne.s32.totalorder %s979_s22, %s975_s21 }
  0x13   : > { %p1120_p7 = por %p187_p6, %p186_p5  ;;  %s62_s16 = ssub.s32 %s1007_s29, %s1380_s10 }
  0x14   : > { %p193_p9 = scmp.eq.s32.totalorder %s724_s8, 3  ;;  %s63_s17 = sor.u32 %s62_s16, %s61_s12 }
  0x15   : > { %p174_p10 = scmp.eq.s32.totalorder %s62_s16, 0  ;;  %p64_p11 = scmp.eq.s32.totalorder %s63_s17, 0 }
  0x16   : > { %p1128_p12 = por %p193_p9, %p192_p8  ;;  %p726_p13 = scmp.ge.s32.totalorder %s1011_s30, 4 }
  0x17   : > { %s1133_s19 = scalar_select %p174_p10, %s983_s23, %s176_s14  }
  0x18   : > { %s1136_s20 = scalar_select %p64_p11, %s991_s25, %s66_s11  }
  0x19   : > { %221 = sbr.rel (%p726_p13) target bundleno = 48 (0x30), region = 32 }
  0x1e   : > { %231 = sbr.rel (!%p1111_p3) target bundleno = 48 (0x30), region = 40  ;;  %s233_s7 = sand.u32 (%p1111_p3), 1, %s991_s25  }
  0x1f   : > { %s742_s8 = sshll.u32 (%p1111_p3), %s1003_s28, 4  ;;  %s727_s12 = sshll.u32 (%p1111_p3), %s233_s7, 6 }
  0x20   : > { %s238_s16 = sadd.s32 (%p1111_p3), %s1007_s29, %s742_s8  ;;  %s1364_s1 = sld [smem:[#allocation12_spill]] (%p1111_p3) }
  0x21   : > { %s730_s17 = sshll.u32 (%p1111_p3), %s238_s16, 3  ;;  %s235_s11 = scalar_lea.vmem (%p1111_p3), [#allocation4], %s727_s12 }
  0x26   : > { %s240_s14 = scalar_lea.vmem %s1364_s1, %s730_s17 }
  0x27   : > { %v283_v0 = vld [vmem:[%s240_s14] sm:$0xff]  ;;  %v285_v1 = vld [vmem:[%s240_s14 + $0x10] sm:$0xff] }
  0x28   : > { %v287_v2 = vld [vmem:[%s240_s14 + $0x20] sm:$0xff]  ;;  %284 = vst [vmem:[%s235_s11] sm:$0xff] %v283_v0  ;;  %v289_v3 = vld [vmem:[%s240_s14 + $0x30] sm:$0xff] }
  0x29   : > { %286 = vst [vmem:[%s235_s11 + $0x8] sm:$0xff] %v285_v1  ;;  %v291_v4 = vld [vmem:[%s240_s14 + $0x40] sm:$0xff]  ;;  %v293_v5 = vld [vmem:[%s240_s14 + $0x50] sm:$0xff] }
  0x2a   : > { %288 = vst [vmem:[%s235_s11 + $0x10] sm:$0xff] %v287_v2  ;;  %v295_v6 = vld [vmem:[%s240_s14 + $0x60] sm:$0xff]  ;;  %v297_v7 = vld [vmem:[%s240_s14 + $0x70] sm:$0xff] }
  0x2b   : > { %290 = vst [vmem:[%s235_s11 + $0x18] sm:$0xff] %v289_v3 }
  0x2c   : > { %292 = vst [vmem:[%s235_s11 + $0x20] sm:$0xff] %v291_v4 }
  0x2d   : > { %294 = vst [vmem:[%s235_s11 + $0x28] sm:$0xff] %v293_v5 }
  0x2e   : > { %296 = vst [vmem:[%s235_s11 + $0x30] sm:$0xff] %v295_v6 }
  0x2f   : > { %298 = vst [vmem:[%s235_s11 + $0x38] sm:$0xff] %v297_v7 }
  0x30 PF: > { %p731_p0 = scmp.ge.s32.totalorder %s1011_s30, 1  ;;  %p303_p1 = scmp.lt.s32.totalorder %s1011_s30, 5 }
  0x32   : > { %p304_p2 = pnand %p731_p0, %p303_p1 }
  0x33   : > { %s310_s9 = sand.u32 (!%p304_p2), 1, %s987_s24   ;;  %s1353_s10 = sand.u32 (!%p304_p2), 1, %s979_s22  }
  0x34   : > { %307 = sbr.rel (%p304_p2) target bundleno = 984 (0x3d8), region = 78  ;;  %s732_s13 = sshll.u32 (!%p304_p2), %s310_s9, 6 }
  0x35   : > { %s1153_s7 = sshll.u32 (!%p304_p2), %s1353_s10, 3  ;;  %p343_p3 = scmp.lt.s32.totalorder (!%p304_p2), %s999_s27, 1 }
  0x36   : > { %s1162_s11 = scalar_lea.vmem (!%p304_p2), [#allocation4], %s732_s13  ;;  %s342_s1 = scalar_lea.vmem (!%p304_p2), [#allocation5], %s1153_s7 }
  0x37   : > { %p735_p4 = scmp.ne.s32.totalorder (!%p304_p2), %s995_s26, 0 }
  0x39   : > { %s344_s8 = scalar_select %p343_p3, %s999_s27, 1 }
  0x3a   : > { %351 = sbr.rel (%p735_p4) target bundleno = 224 (0xe0), region = 86 }
  0x3b   : > { %s734_s12 = sshll.u32 %s344_s8, 3 }
  0x3c   : > { %s1160_s14 = scalar_lea.vmem %s1344_s0, %s734_s12 }
  0x3f   : > { %v368_v8 = vld [vmem:[%s1346_s2 + $0x78] sm:$0xff]  ;;  %v367_v9 = vld [vmem:[%s1346_s2 + $0x70] sm:$0xff]  ;;  %v366_v10 = vld [vmem:[%s1346_s2 + $0x68] sm:$0xff]  ;;  %vm393_vm0 = vcmask 523264  }
  0x40   : > { %373 = vmatpush.msra.mxu0 %v368_v8  ;;  %v365_v11 = vld [vmem:[%s1346_s2 + $0x60] sm:$0xff]  ;;  %v364_v12 = vld [vmem:[%s1346_s2 + $0x58] sm:$0xff]  ;;  %v363_v13 = vld [vmem:[%s1346_s2 + $0x50] sm:$0xff] }
  0x41   : > { %v362_v14 = vld [vmem:[%s1346_s2 + $0x48] sm:$0xff]  ;;  %v361_v15 = vld [vmem:[%s1346_s2 + $0x40] sm:$0xff]  ;;  %v360_v16 = vld [vmem:[%s1346_s2 + $0x38] sm:$0xff] }
  0x42   : > { %374 = vmatpush.msra.mxu0 %v367_v9  ;;  %v359_v17 = vld [vmem:[%s1346_s2 + $0x30] sm:$0xff]  ;;  %v358_v18 = vld [vmem:[%s1346_s2 + $0x28] sm:$0xff]  ;;  %v357_v19 = vld [vmem:[%s1346_s2 + $0x20] sm:$0xff] }
  0x43   : > { %v356_v20 = vld [vmem:[%s1346_s2 + $0x18] sm:$0xff]  ;;  %v355_v21 = vld [vmem:[%s1346_s2 + $0x10] sm:$0xff]  ;;  %v354_v22 = vld [vmem:[%s1346_s2 + $0x8] sm:$0xff] }
  0x44   : > { %375 = vmatpush.msra.mxu0 %v366_v10  ;;  %v353_v23 = vld [vmem:[%s1346_s2] sm:$0xff] }
  0x45   : > { %v352_v24 = vld [vmem:[%s1160_s14] sm:$0xff] }
  0x46   : > { %376 = vmatpush.msra.mxu0 %v365_v11  ;;  %v879_v25 = vld [vmem:[%s1348_s4] ss:$0 sm:$0xff] }
  0x48   : > { %377 = vmatpush.msra.mxu0 %v364_v12 }
  0x4a   : > { %378 = vmatpush.msra.mxu0 %v363_v13 }
  0x4c   : > { %379 = vmatpush.msra.mxu0 %v362_v14 }
  0x4e   : > { %380 = vmatpush.msra.mxu0 %v361_v15 }
  0x50   : > { %381 = vmatpush.msra.mxu0 %v360_v16 }
  0x52   : > { %382 = vmatpush.msra.mxu0 %v359_v17 }
  0x54   : > { %383 = vmatpush.msra.mxu0 %v358_v18 }
  0x56   : > { %384 = vmatpush.msra.mxu0 %v357_v19 }
  0x58   : > { %385 = vmatpush.msra.mxu0 %v356_v20 }
  0x5a   : > { %386 = vmatpush.msra.mxu0 %v355_v21 }
  0x5c   : > { %387 = vmatpush.msra.mxu0 %v354_v22 }
  0x5e   : > { %388 = vmatpush.msra.mxu0 %v353_v23 }
  0x5f   : > { %389 = vmatmul.f32.vlgmr.msra.gmra.mxu0 %v352_v24 }
  0xdc   : > { %v390_v26 = vpop.f32.mrf.mxu0 }
  0xdd   : > { %v391_v27 = vadd.f32 %v879_v25, %v390_v26 }
  0xdf   : > { %394 = vst.msk [vmem:[#allocation2] sm:$0xff] %vm393_vm0, %v391_v27 }
  0xe0 PF: > { %v418_v28 = vld [vmem:[%s1347_s3 + $0x78] sm:$0xff]  ;;  %v417_v29 = vld [vmem:[%s1347_s3 + $0x70] sm:$0xff]  ;;  %v416_v30 = vld [vmem:[%s1347_s3 + $0x68] sm:$0xff]  ;;  %vm489_vm1 = vcmask 523264   ;;  %vm533_vm2 = vcmask 1041409   ;;  %vm535_vm3 = vcmask 1042434  }
  0xe1   : > { %419 = vmatpush.msra.mxu0 %v418_v28  ;;  %744 = vmatpush.msra.mxu2 %v418_v28  ;;  %v415_v31 = vld [vmem:[%s1347_s3 + $0x60] sm:$0xff]  ;;  %v414_v32 = vld [vmem:[%s1347_s3 + $0x58] sm:$0xff]  ;;  %v413_v33 = vld [vmem:[%s1347_s3 + $0x50] sm:$0xff]  ;;  %vm537_vm4 = vcmask 1043459   ;;  %vm539_vm5 = vcmask 1044484   ;;  %vm541_vm6 = vcmask 1045509  }
  0xe2   : > { %743 = vmatpush.msra.mxu1 %v418_v28  ;;  %745 = vmatpush.msra.mxu3 %v418_v28  ;;  %v412_v34 = vld [vmem:[%s1347_s3 + $0x48] sm:$0xff]  ;;  %v411_v35 = vld [vmem:[%s1347_s3 + $0x40] sm:$0xff]  ;;  %v410_v36 = vld [vmem:[%s1347_s3 + $0x38] sm:$0xff]  ;;  %vm543_vm7 = vcmask 1046534   ;;  %vm545_vm8 = vcmask 1047559   ;;  %vm549_vm9 = vcmask 64512  }
  0xe3   : > { %420 = vmatpush.msra.mxu0 %v417_v29  ;;  %747 = vmatpush.msra.mxu2 %v417_v29  ;;  %v409_v37 = vld [vmem:[%s1347_s3 + $0x30] sm:$0xff]  ;;  %v408_v38 = vld [vmem:[%s1347_s3 + $0x28] sm:$0xff]  ;;  %v407_v39 = vld [vmem:[%s1347_s3 + $0x20] sm:$0xff]  ;;  %p737_p5 = scmp.ne.s32.totalorder %s995_s26, 1 }
  0xe4   : > { %746 = vmatpush.msra.mxu1 %v417_v29  ;;  %748 = vmatpush.msra.mxu3 %v417_v29  ;;  %v406_v40 = vld [vmem:[%s1347_s3 + $0x18] sm:$0xff]  ;;  %v405_v41 = vld [vmem:[%s1347_s3 + $0x10] sm:$0xff]  ;;  %v404_v42 = vld [vmem:[%s1347_s3 + $0x8] sm:$0xff] }
  0xe5   : > { %421 = vmatpush.msra.mxu0 %v416_v30  ;;  %750 = vmatpush.msra.mxu2 %v416_v30  ;;  %v403_v43 = vld [vmem:[%s1347_s3] sm:$0xff]  ;;  %v395_v44 = vld [vmem:[%s1162_s11] sm:$0xff]  ;;  %v397_v46 = vld [vmem:[%s1162_s11 + $0x10] sm:$0xff] }
  0xe6   : > { %749 = vmatpush.msra.mxu1 %v416_v30  ;;  %751 = vmatpush.msra.mxu3 %v416_v30  ;;  %v399_v45 = vld [vmem:[%s1162_s11 + $0x20] sm:$0xff]  ;;  %v401_v47 = vld [vmem:[%s1162_s11 + $0x30] sm:$0xff]  ;;  %v396_v48 = vld [vmem:[%s1162_s11 + $0x8] sm:$0xff] }
  0xe7   : > { %422 = vmatpush.msra.mxu0 %v415_v31  ;;  %753 = vmatpush.msra.mxu2 %v415_v31  ;;  %v400_v49 = vld [vmem:[%s1162_s11 + $0x28] sm:$0xff]  ;;  %v398_v50 = vld [vmem:[%s1162_s11 + $0x18] sm:$0xff] }
  0xe8   : > { %752 = vmatpush.msra.mxu1 %v415_v31  ;;  %754 = vmatpush.msra.mxu3 %v415_v31  ;;  %v402_v51 = vld [vmem:[%s1162_s11 + $0x38] sm:$0xff]  ;;  %v460_v52 = vld [vmem:[#allocation2] sm:$0xff]  ;;  %v523_v31 = vlaneseq  ;;  %s736_s11 = sshll.u32 %s995_s26, 3 }
  0xe9   : > { %423 = vmatpush.msra.mxu0 %v414_v32  ;;  %756 = vmatpush.msra.mxu2 %v414_v32  ;;  %v880_v57 = vld [vmem:[%s1349_s5] ss:$0 sm:$0xff]  ;;  %s548_s8 = scalar_lea.vmem [#allocation3], %s736_s11 }
  0xea   : > { %755 = vmatpush.msra.mxu1 %v414_v32  ;;  %757 = vmatpush.msra.mxu3 %v414_v32 }
  0xeb   : > { %424 = vmatpush.msra.mxu0 %v413_v33  ;;  %759 = vmatpush.msra.mxu2 %v413_v33 }
  0xec   : > { %758 = vmatpush.msra.mxu1 %v413_v33  ;;  %760 = vmatpush.msra.mxu3 %v413_v33  ;;  %v524_v33 = vand.u32 127, %v523_v31 }
  0xed   : > { %425 = vmatpush.msra.mxu0 %v412_v34  ;;  %762 = vmatpush.msra.mxu2 %v412_v34 }
  0xee   : > { %761 = vmatpush.msra.mxu1 %v412_v34  ;;  %763 = vmatpush.msra.mxu3 %v412_v34 }
  0xef   : > { %426 = vmatpush.msra.mxu0 %v411_v35  ;;  %765 = vmatpush.msra.mxu2 %v411_v35 }
  0xf0   : > { %764 = vmatpush.msra.mxu1 %v411_v35  ;;  %766 = vmatpush.msra.mxu3 %v411_v35 }
  0xf1   : > { %427 = vmatpush.msra.mxu0 %v410_v36  ;;  %768 = vmatpush.msra.mxu2 %v410_v36 }
  0xf2   : > { %767 = vmatpush.msra.mxu1 %v410_v36  ;;  %769 = vmatpush.msra.mxu3 %v410_v36 }
  0xf3   : > { %428 = vmatpush.msra.mxu0 %v409_v37  ;;  %771 = vmatpush.msra.mxu2 %v409_v37 }
  0xf4   : > { %770 = vmatpush.msra.mxu1 %v409_v37  ;;  %772 = vmatpush.msra.mxu3 %v409_v37 }
  0xf5   : > { %429 = vmatpush.msra.mxu0 %v408_v38  ;;  %774 = vmatpush.msra.mxu2 %v408_v38 }
  0xf6   : > { %773 = vmatpush.msra.mxu1 %v408_v38  ;;  %775 = vmatpush.msra.mxu3 %v408_v38 }
  0xf7   : > { %430 = vmatpush.msra.mxu0 %v407_v39  ;;  %777 = vmatpush.msra.mxu2 %v407_v39 }
  0xf8   : > { %776 = vmatpush.msra.mxu1 %v407_v39  ;;  %778 = vmatpush.msra.mxu3 %v407_v39 }
  0xf9   : > { %431 = vmatpush.msra.mxu0 %v406_v40  ;;  %780 = vmatpush.msra.mxu2 %v406_v40 }
  0xfa   : > { %779 = vmatpush.msra.mxu1 %v406_v40  ;;  %781 = vmatpush.msra.mxu3 %v406_v40 }
  0xfb   : > { %432 = vmatpush.msra.mxu0 %v405_v41  ;;  %783 = vmatpush.msra.mxu2 %v405_v41 }
  0xfc   : > { %782 = vmatpush.msra.mxu1 %v405_v41  ;;  %784 = vmatpush.msra.mxu3 %v405_v41 }
  0xfd   : > { %433 = vmatpush.msra.mxu0 %v404_v42  ;;  %786 = vmatpush.msra.mxu2 %v404_v42 }
  0xfe   : > { %785 = vmatpush.msra.mxu1 %v404_v42  ;;  %787 = vmatpush.msra.mxu3 %v404_v42 }
  0xff   : > { %434 = vmatpush.msra.mxu0 %v403_v43  ;;  %789 = vmatpush.msra.mxu2 %v403_v43 }
 0x100   : > { %788 = vmatpush.msra.mxu1 %v403_v43  ;;  %435 = vmatmul.f32.vlgmr.msra.gmra.mxu0 %v395_v44 }
 0x101   : > { %447 = vmatmul.f32.vlgmr.msra.gmra.mxu2 %v399_v45  ;;  %441 = vmatmul.f32.vlgmr.msra.gmra.mxu1 %v397_v46 }
 0x102   : > { %790 = vmatpush.msra.mxu3 %v403_v43 }
 0x103   : > { %453 = vmatmul.f32.vlgmr.msra.gmra.mxu3 %v401_v47 }
 0x108   : > { %438 = vmatmul.f32.gmra.mxu0 %v396_v48 }
 0x109   : > { %450 = vmatmul.f32.gmra.mxu2 %v400_v49  ;;  %444 = vmatmul.f32.gmra.mxu1 %v398_v50 }
 0x10b   : > { %456 = vmatmul.f32.gmra.mxu3 %v402_v51 }
 0x17d   : > { %v436_v53 = vpop.f32.mrf.mxu0 }
 0x17e   : > { %v461_v54 = vadd.f32 %v460_v52, %v436_v53  ;;  %v442_v55 = vpop.f32.mrf.mxu1 }
 0x17f   : > { %v463_v56 = vadd.f32 %v460_v52, %v442_v55 }
 0x180   : > { %881 = vtanh.f32 %v461_v54 }
 0x181   : > { %883 = vtanh.f32 %v463_v56 }
 0x184   : > { %v448_v58 = vpop.f32.mrf.mxu2 }
 0x185   : > { %v465_v59 = vadd.f32 %v460_v52, %v448_v58  ;;  %v439_v60 = vpop.f32.mrf.mxu0 }
 0x186   : > { %v882_v61 = vpop.eup %881  ;;  %v462_v62 = vadd.f32 %v460_v52, %v439_v60  ;;  %v445_v63 = vpop.f32.mrf.mxu1 }
 0x187   : > { %v454_v0 = vpop.f32.mrf.mxu3  ;;  %v884_v1 = vpop.eup %883  ;;  %885 = vtanh.f32 %v465_v59  ;;  %v464_v2 = vadd.f32 %v460_v52, %v445_v63  ;;  %v481_v3 = vmul.f32 %v882_v61, %v880_v57 }
 0x188   : > { %887 = vtanh.f32 %v462_v62  ;;  %v467_v4 = vadd.f32 %v460_v52, %v454_v0  ;;  %v483_v5 = vmul.f32 %v884_v1, %v880_v57 }
 0x189   : > { %889 = vtanh.f32 %v464_v2  ;;  %v490_v6 = vsel %vm489_vm1, %v481_v3, 0.0 }
 0x18a   : > { %491 = vadd.xlane.f32.xlu0 %v490_v6  ;;  %v496_v7 = vsel %vm489_vm1, %v483_v5, 0.0  ;;  %891 = vtanh.f32 %v467_v4 }
 0x18b   : > { %497 = vadd.xlane.f32.xlu1 %v496_v7 }
 0x18c   : > { %v451_v8 = vpop.f32.mrf.mxu2 }
 0x18d   : > { %v886_v9 = vpop.eup %885  ;;  %v466_v10 = vadd.f32 %v460_v52, %v451_v8 }
 0x18e   : > { %v888_v11 = vpop.eup %887  ;;  %v485_v13 = vmul.f32 %v886_v9, %v880_v57 }
 0x18f   : > { %v457_v12 = vpop.f32.mrf.mxu3  ;;  %v890_v14 = vpop.eup %889  ;;  %893 = vtanh.f32 %v466_v10  ;;  %v482_v16 = vmul.f32 %v888_v11, %v880_v57 }
 0x190   : > { %v468_v15 = vadd.f32 %v460_v52, %v457_v12  ;;  %v502_v17 = vsel %vm489_vm1, %v485_v13, 0.0  ;;  %v484_v18 = vmul.f32 %v890_v14, %v880_v57  ;;  %v892_v20 = vpop.eup %891 }
 0x191   : > { %503 = vadd.xlane.f32.xlu2 %v502_v17  ;;  %v493_v19 = vsel %vm489_vm1, %v482_v16, 0.0  ;;  %v487_v23 = vmul.f32 %v892_v20, %v880_v57 }
 0x192   : > { %895 = vtanh.f32 %v468_v15  ;;  %494 = vadd.xlane.f32.xlu0 %v493_v19  ;;  %v499_v21 = vsel %vm489_vm1, %v484_v18, 0.0 }
 0x193   : > { %500 = vadd.xlane.f32.xlu1 %v499_v21  ;;  %v508_v28 = vsel %vm489_vm1, %v487_v23, 0.0 }
 0x195   : > { %v894_v22 = vpop.eup %893 }
 0x196   : > { %v486_v24 = vmul.f32 %v894_v22, %v880_v57 }
 0x198   : > { %v896_v25 = vpop.eup %895  ;;  %v505_v26 = vsel %vm489_vm1, %v486_v24, 0.0 }
 0x199   : > { %v488_v27 = vmul.f32 %v896_v25, %v880_v57  ;;  %506 = vadd.xlane.f32.xlu2 %v505_v26 }
 0x19a   : > { %509 = vadd.xlane.f32.xlu0 %v508_v28 }
 0x19b   : > { %v511_v29 = vsel %vm489_vm1, %v488_v27, 0.0 }
 0x19c   : > { %512 = vadd.xlane.f32.xlu1 %v511_v29 }
 0x1fd   : > { %v492_v30 = vpop.xlane.xlu0 %491 }
 0x1fe   : > { %v498_v32 = vpop.xlane.xlu1 %497  ;;  %v525_v36 = vperm.slane %v492_v30, %v524_v33 }
 0x1ff   : > { %v527_v39 = vperm.slane %v498_v32, %v524_v33 }
 0x204   : > { %v504_v34 = vpop.xlane.xlu2 %503 }
 0x205   : > { %v495_v35 = vpop.xlane.xlu0 %494  ;;  %v529_v44 = vperm.slane %v504_v34, %v524_v33 }
 0x206   : > { %v526_v37 = vperm.slane %v495_v35, %v524_v33  ;;  %v501_v38 = vpop.xlane.xlu1 %500 }
 0x207   : > { %v528_v40 = vperm.slane %v501_v38, %v524_v33 }
 0x208   : > { %v534_v41 = vsel %vm533_vm2, %v526_v37, %v525_v36 }
 0x209   : > { %v536_v42 = vsel %vm535_vm3, %v527_v39, %v534_v41 }
 0x20a   : > { %v538_v43 = vsel %vm537_vm4, %v528_v40, %v536_v42 }
 0x20b   : > { %v540_v48 = vsel %vm539_vm5, %v529_v44, %v538_v43 }
 0x20c   : > { %v507_v45 = vpop.xlane.xlu2 %506 }
 0x20d   : > { %v530_v46 = vperm.slane %v507_v45, %v524_v33  ;;  %v510_v47 = vpop.xlane.xlu0 %509 }
 0x20e   : > { %v531_v49 = vperm.slane %v510_v47, %v524_v33 }
 0x20f   : > { %v513_v50 = vpop.xlane.xlu1 %512  ;;  %v542_v51 = vsel %vm541_vm6, %v530_v46, %v540_v48  ;;  %554 = sbr.rel (%p737_p5) target bundleno = 969 (0x3c9), region = 90 }
 0x210   : > { %v532_v52 = vperm.slane %v513_v50, %v524_v33  ;;  %v544_v53 = vsel %vm543_vm7, %v531_v49, %v542_v51 }
 0x212   : > { %v546_v54 = vsel %vm545_vm8, %v532_v52, %v544_v53 }
 0x213   : > { %550 = vst.msk [vmem:[%s548_s8] sm:$0xff] %vm549_vm9, %v546_v54 }
 0x214   : > { %vm589_vm10 = vcmask 130048  }
 0x21a   : > { %v555_v55 = vld [vmem:[#allocation3] sm:$0xff]  ;;  %v556_v56 = vld [vmem:[#allocation3 + $0x8] sm:$0xff] }
 0x21b   : > { %557 = vxpose.xlu0.b32.start [1/2] (short) (narrow) %v555_v55, 8 }
 0x223   : > { %558 = vxpose.xlu0.b32.end [2/2] (short) (narrow) %v556_v56, 8 }
 0x2bf   : > { %v573_v57 = vpop.trf.xlu0 }
 0x2c0   : > { %v590_v58 = vsel %vm589_vm10, %v573_v57, -inf }
 0x2c1   : > { %591 = vmax.xlane.f32.xlu1 %v590_v58 }
 0x334   : > { %v592_v59 = vpop.xlane.xlu1 %591 }
 0x335   : > { %v593_v60 = vsub.f32 %v573_v57, %v592_v59 }
 0x337   : > { %v594_v61 = vmul.f32 1.442695, %v593_v60 }
 0x339   : > { %897 = vpow2.f32 %v594_v61 }
 0x33f   : > { %v898_v62 = vpop.eup %897 }
 0x340   : > { %v596_v63 = vsel %vm589_vm10, %v898_v62, 0.0 }
 0x341   : > { %597 = vadd.xlane.f32.xlu1 %v596_v63 }
 0x3b4   : > { %v598_v0 = vpop.xlane.xlu1 %597 }
 0x3b5   : > { %899 = vrcp.f32 %v598_v0  ;;  %v610_v4 = vand.u32 2147483648, %v598_v0  ;;  %v608_v6 = vand.u32 2147483647, %v598_v0  ;;  %vm604_vm12 = vweird.f32 %v598_v0 }
 0x3b7   : > { %v611_v8 = vor.u32 1.1754944e-38, %v610_v4  ;;  %vm609_vm14 = vcmp.eq.f32.partialorder %v608_v6, 8.507059e+37 }
 0x3bb   : > { %v900_v1 = vpop.eup %899 }
 0x3bc   : > { %v600_v2 = vmul.f32 %v900_v1, %v598_v0  ;;  %vm605_vm11 = vweird.f32 %v900_v1 }
 0x3bd   : > { %vm606_vm13 = vmor %vm604_vm12, %vm605_vm11 }
 0x3be   : > { %v601_v3 = vsub.f32 1.0, %v600_v2 }
 0x3c0   : > { %v602_v5 = vmul.f32 %v900_v1, %v601_v3 }
 0x3c2   : > { %v603_v7 = vadd.f32 %v900_v1, %v602_v5 }
 0x3c4   : > { %v607_v9 = vsel %vm606_vm13, %v900_v1, %v603_v7 }
 0x3c5   : > { %v612_v10 = vsel %vm609_vm14, %v611_v8, %v607_v9 }
 0x3c6   : > { %v613_v11 = vmul.f32 %v898_v62, %v612_v10 }
 0x3c8   : > { %614 = vst.msk [vmem:[%s342_s1] sm:$0xff] %vm589_vm10, %v613_v11 }
 0x3c9 PF: > { %s739_s26 = sshll.u32 %s999_s27, 3  ;;  %s628_s16 = sshll.u32 %s342_s1, 4  ;;  %s629_s16 = int_to_ptr.vmem [resolvable:$true] %s628_s16 }
 0x3ca   : > { %s626_s14 = scalar_lea.hbm %s1350_s6, %s739_s26  ;;  %s1365_s24 = sand.u32 1, %s979_s22  }
 0x3cb   : > { %s630_s17 = sshll.u32 %s626_s14, 4  ;;  %s616_s9 = scalar_lea.sflag [#allocation6], %s1365_s24  ;;  %s631_s17 = int_to_ptr.hbm [resolvable:$true] %s630_s17 }
 0x3cc   : > { %s915_s29 = sshra.s32 %s631_s17, 4  ;;  %s921_s11 = scalar_lea.hbm %s1350_s6, 16  ;;  %s916_s29 = int_to_ptr.hbm [resolvable:$true] %s915_s29 }
 0x3cd   : > { %s917_s10 = scalar_lea.hbm %s916_s29, 8  ;;  %p922_p10 = scmp.lt.s32.totalorder %s916_s29, %s1350_s6 }
 0x3ce   : > { %p918_p6 = scmp.ne.s32.totalorder %s916_s29, %s917_s10  ;;  %p923_p11 = scmp.lt.s32.totalorder %s921_s11, %s917_s10 }
 0x3d0   : > { %p919_p8 = pnand %p918_p6, %p1120_p7  ;;  %p924_p13 = por %p923_p11, %p922_p10 }
 0x3d2   : > { %p920_p9 = pneg %p919_p8 }
 0x3d4   : > { %p925_p0 = pnand %p924_p13, %p920_p9 }
 0x3d6   : > { %928 = shalt.err (!%p925_p0)
}
 0x3d7   : > { %791 = dma.vmem_to_hbm [thread:$0]  (%p1120_p7), %s629_s16, 128, %s631_s17, %s616_s9  }
 0x3d8 PF: > { %p797_p1 = scmp.ge.s32.totalorder %s1011_s30, 2  ;;  %s642_s1 = sand.u32 1, %s975_s21  }
 0x3d9   : > { %s643_s7 = scalar_lea.sflag [#allocation6], %s642_s1 }
 0x3da   : > { %p794_p2 = pnand %p797_p1, %p1128_p12 }
 0x3dc   : > { %p795_p3 = pneg %p794_p2 }
 0x3de   : > { %970 = dma.done.wait (%p795_p3), %s643_s7, 128  }
 0x3df   : > { %972 = vsyncadd (%p795_p3), %s643_s7, 4294967168  ;;  %s19_s30 = sadd.s32 1, %s1011_s30   ;;  %s1366_s26 = sld [smem:[#allocation8_spill]] }
 0x3e0   : > { %p16_p4 = scmp.ge.s32.totalorder %s19_s30, 6   ;;  %s1367_s27 = sld [smem:[#allocation9_spill]] }
 0x3e1   : > { %s1368_s28 = sld [smem:[#allocation10_spill]]  ;;  %s1370_s21 = smov %s979_s22 }
 0x3e2   : > { %s1369_s29 = sld [smem:[#allocation11_spill]]  ;;  %s1371_s22 = smov %s983_s23 }
 0x3e3   : > { %s1372_s23 = smov %s1133_s19  ;;  %s1373_s24 = smov %s991_s25 }
 0x3e4   : > { %s1374_s25 = smov %s1136_s20  ;;  %18 = sbr.rel (!%p16_p4) target bundleno = 8 (0x8), region = 134 }
 0x3e9   :  { %649 = vsyncpa [#allocation6], 1 }
 0x3ea   :  { %651 = vsyncpa [#allocation6 + $0x1], 1 }

</bundles_post_ra>
